<compile_context>
chip_gen: v6e
topology: v6e:2x2x1
jax: 0.10.0
libtpu: 0.0.40
codegen_flags: <defaults>
</compile_context>

<pallas_src>
import math

import numpy as np
import jax
import jax.numpy as jnp
from jax import lax
from jax.experimental import pallas as pl
from jax.experimental.pallas import tpu as pltpu


def _time_mlp_kernel(t_ref, freqs2_ref, w1_ref, b1_ref, w2_ref, b2_ref, out_ref):
    # t_ref:      (B, 1)             f32 VMEM  — timesteps as a column
    # freqs2_ref: (1, dim)           f32 VMEM  — [freqs, freqs] pre-tiled host-side
    # w1_ref:     (dim, time_dim)    bf16 VMEM
    # b1_ref:     (1, time_dim)      f32 VMEM
    # w2_ref:     (time_dim, time_dim) bf16 VMEM
    # b2_ref:     (1, time_dim)      f32 VMEM
    # out_ref:    (B, time_dim)      f32 VMEM  — Unet.time_mlp(times)
    b = t_ref.shape[0]
    dim = freqs2_ref.shape[1]
    half_dim = dim // 2

    # Phase built entirely in registers: (B,1) lane-broadcast * (1,dim)
    # sublane-broadcast -> (B, dim).  No scratch, no scalar loop.
    phase = t_ref[...] * freqs2_ref[...]

    # emb[:, :half] = sin(phase[:, :half]); emb[:, half:] = cos(phase[:, half:])
    # realized as a single full-tile lane select (VPU), sin/cos on the EUP.
    lane = lax.broadcasted_iota(jnp.int32, (b, dim), 1)
    emb = jnp.where(lane < half_dim, jnp.sin(phase), jnp.cos(phase))

    # Fused time-MLP. MXU operands in bf16, f32 accumulation; matmuls consume
    # register values directly (no VMEM store->load before the MXU push).
    h = jnp.dot(emb.astype(w1_ref.dtype), w1_ref[...],
                preferred_element_type=jnp.float32)
    h = h + b1_ref[...]
    # TODO(synk): torch nn.GELU() defaults to the exact erf form; the tanh
    # approximation is used here (erf has no guaranteed Mosaic lowering) —
    # difference vs PyTorch is < 1e-3.
    h = jax.nn.gelu(h, approximate=True)

    out = jnp.dot(h.astype(w2_ref.dtype), w2_ref[...],
                  preferred_element_type=jnp.float32)
    out_ref[...] = out + b2_ref[...]


def sinusoidal_time_mlp(times, w1, b1, w2, b2, *, dim, theta=10000.0,
                        mxu_dtype=jnp.bfloat16):
    """times: (B,) -> t_emb (B, time_dim) == Unet.time_mlp(times).

    w1: (dim, time_dim), w2: (time_dim, time_dim) — (in, out) layout, i.e.
    torch Linear.weight transposed.  b1/b2: (time_dim,).
    """
    assert dim % 2 == 0 and dim >= 4, "dim must be even and >= 4"
    half_dim = dim // 2
    b = times.shape[0]
    time_dim = w1.shape[1]
    assert w1.shape == (dim, time_dim)
    assert w2.shape == (time_dim, time_dim)
    assert b1.shape == (time_dim,) and b2.shape == (time_dim,)

    # Compile-time constant frequencies, pre-tiled to (1, dim) = [freqs, freqs]
    # so sin/cos + lane-select run on one full tile (no in-kernel iota/exp for
    # the frequency table, no lane-axis concatenate).
    scale = math.log(theta) / (half_dim - 1)
    freqs = np.exp(np.arange(half_dim, dtype=np.float32) * -scale)
    freqs2 = jnp.asarray(np.concatenate([freqs, freqs]), dtype=jnp.float32)
    freqs2 = freqs2.reshape(1, dim)

    t_col = times.astype(jnp.float32).reshape(b, 1)
    b1_2d = b1.astype(jnp.float32).reshape(1, time_dim)
    b2_2d = b2.astype(jnp.float32).reshape(1, time_dim)

    vmem = pl.BlockSpec(memory_space=pltpu.MemorySpace.VMEM)
    return pl.pallas_call(
        _time_mlp_kernel,
        out_shape=jax.ShapeDtypeStruct((b, time_dim), jnp.float32),
        in_specs=[vmem] * 6,
        out_specs=vmem,
    )(t_col, freqs2, w1.astype(mxu_dtype), b1_2d, w2.astype(mxu_dtype), b2_2d)


def _reference(times, w1, b1, w2, b2, dim, theta=10000.0):
    # Pure-JAX f32 reference for Unet.time_mlp (lucidrains SinusoidalPosEmb:
    # half_dim - 1 denominator, matching the spec).
    half_dim = dim // 2
    scale = math.log(theta) / (half_dim - 1)
    freqs = jnp.exp(jnp.arange(half_dim, dtype=jnp.float32) * -scale)
    ph = times.astype(jnp.float32)[:, None] * freqs[None, :]
    emb = jnp.concatenate([jnp.sin(ph), jnp.cos(ph)], axis=-1)
    h = emb @ w1 + b1
    h = jax.nn.gelu(h, approximate=True)
    return h @ w2 + b2


if __name__ == "__main__":
    key = jax.random.PRNGKey(0)
    k_t, k_w1, k_b1, k_w2, k_b2 = jax.random.split(key, 5)

    B, DIM = 8, 32
    TIME_DIM = DIM * 4  # = 128, lane-dense primary output

    times = jax.random.uniform(k_t, (B,), dtype=jnp.float32,
                               minval=0.0, maxval=1000.0)
    w1 = jax.random.normal(k_w1, (DIM, TIME_DIM), dtype=jnp.float32) / math.sqrt(DIM)
    b1 = jax.random.normal(k_b1, (TIME_DIM,), dtype=jnp.float32) * 0.1
    w2 = jax.random.normal(k_w2, (TIME_DIM, TIME_DIM), dtype=jnp.float32) / math.sqrt(TIME_DIM)
    b2 = jax.random.normal(k_b2, (TIME_DIM,), dtype=jnp.float32) * 0.1

    t_emb = sinusoidal_time_mlp(times, w1, b1, w2, b2, dim=DIM)
    t_emb = jax.block_until_ready(t_emb)

    t_emb_ref = _reference(times, w1, b1, w2, b2, DIM)

    assert t_emb.shape == (B, TIME_DIM)
    # Tolerance covers bf16 MXU operands (f32 accumulation) vs the f32 reference.
    assert jnp.allclose(t_emb, t_emb_ref, atol=2e-2, rtol=2e-2), "time-MLP mismatch"

    print("KERNEL_OK")
</pallas_src>

<mosaic_0001>
module attributes {stable_mosaic.version = 11 : i64} {
  func.func @_time_mlp_kernel(%arg0: memref<8x1xf32, #tpu.memory_space<vmem>>, %arg1: memref<1x32xf32, #tpu.memory_space<vmem>>, %arg2: memref<32x128xbf16, #tpu.memory_space<vmem>>, %arg3: memref<1x128xf32, #tpu.memory_space<vmem>>, %arg4: memref<128x128xbf16, #tpu.memory_space<vmem>>, %arg5: memref<1x128xf32, #tpu.memory_space<vmem>>, %arg6: memref<8x128xf32, #tpu.memory_space<vmem>>) attributes {dimension_semantics = [], scalar_prefetch = 0 : i64, scratch_operands = 0 : i64, tpu.core_type = #tpu.core_type<tc>} {
    %c0 = arith.constant 0 : index
    %c0_0 = arith.constant 0 : index
    %0 = vector.load %arg0[%c0, %c0_0] : memref<8x1xf32, #tpu.memory_space<vmem>>, vector<8x1xf32>
    %c0_1 = arith.constant 0 : index
    %c0_2 = arith.constant 0 : index
    %1 = vector.load %arg1[%c0_1, %c0_2] : memref<1x32xf32, #tpu.memory_space<vmem>>, vector<1x32xf32>
    %2 = vector.broadcast %0 : vector<8x1xf32> to vector<8x32xf32>
    %3 = vector.broadcast %1 : vector<1x32xf32> to vector<8x32xf32>
    %4 = arith.mulf %2, %3 : vector<8x32xf32>
    %5 = tpu.iota {dimensions = array<i32: 1>} : vector<8x32xi32>
    %c16_i32 = arith.constant 16 : i32
    %6 = vector.broadcast %c16_i32 : i32 to vector<8x32xi32>
    %7 = arith.cmpi slt, %5, %6 : vector<8x32xi32>
    %8 = math.sin %4 : vector<8x32xf32>
    %9 = math.cos %4 : vector<8x32xf32>
    %10 = arith.select %7, %8, %9 : vector<8x32xi1>, vector<8x32xf32>
    %11 = arith.truncf %10 : vector<8x32xf32> to vector<8x32xbf16>
    %c0_3 = arith.constant 0 : index
    %c0_4 = arith.constant 0 : index
    %12 = vector.load %arg2[%c0_3, %c0_4] : memref<32x128xbf16, #tpu.memory_space<vmem>>, vector<32x128xbf16>
    %cst = arith.constant dense<0.000000e+00> : vector<8x128xf32>
    %13 = tpu.matmul %11, %12, %cst {dimension_numbers = #tpu.dot_dimension_numbers<[1], [0], [0], [1], [0, 0, 1, 1], [], []>} : vector<8x32xbf16>, vector<32x128xbf16>, vector<8x128xf32> -> vector<8x128xf32>
    %c0_5 = arith.constant 0 : index
    %c0_6 = arith.constant 0 : index
    %14 = vector.load %arg3[%c0_5, %c0_6] : memref<1x128xf32, #tpu.memory_space<vmem>>, vector<1x128xf32>
    %15 = vector.broadcast %14 : vector<1x128xf32> to vector<8x128xf32>
    %16 = arith.addf %13, %15 : vector<8x128xf32>
    %17 = arith.mulf %16, %16 : vector<8x128xf32>
    %18 = arith.mulf %16, %17 : vector<8x128xf32>
    %cst_7 = arith.constant 4.471500e-02 : f32
    %19 = vector.broadcast %cst_7 : f32 to vector<8x128xf32>
    %20 = arith.mulf %19, %18 : vector<8x128xf32>
    %21 = arith.addf %16, %20 : vector<8x128xf32>
    %cst_8 = arith.constant 0.797884583 : f32
    %22 = vector.broadcast %cst_8 : f32 to vector<8x128xf32>
    %23 = arith.mulf %22, %21 : vector<8x128xf32>
    %24 = math.tanh %23 : vector<8x128xf32>
    %cst_9 = arith.constant 1.000000e+00 : f32
    %25 = vector.broadcast %cst_9 : f32 to vector<8x128xf32>
    %26 = arith.addf %25, %24 : vector<8x128xf32>
    %cst_10 = arith.constant 5.000000e-01 : f32
    %27 = vector.broadcast %cst_10 : f32 to vector<8x128xf32>
    %28 = arith.mulf %27, %26 : vector<8x128xf32>
    %29 = arith.mulf %16, %28 : vector<8x128xf32>
    %30 = arith.truncf %29 : vector<8x128xf32> to vector<8x128xbf16>
    %c0_11 = arith.constant 0 : index
    %c0_12 = arith.constant 0 : index
    %31 = vector.load %arg4[%c0_11, %c0_12] : memref<128x128xbf16, #tpu.memory_space<vmem>>, vector<128x128xbf16>
    %cst_13 = arith.constant dense<0.000000e+00> : vector<8x128xf32>
    %32 = tpu.matmul %30, %31, %cst_13 {dimension_numbers = #tpu.dot_dimension_numbers<[1], [0], [0], [1], [0, 0, 1, 1], [], []>} : vector<8x128xbf16>, vector<128x128xbf16>, vector<8x128xf32> -> vector<8x128xf32>
    %c0_14 = arith.constant 0 : index
    %c0_15 = arith.constant 0 : index
    %33 = vector.load %arg5[%c0_14, %c0_15] : memref<1x128xf32, #tpu.memory_space<vmem>>, vector<1x128xf32>
    %34 = vector.broadcast %33 : vector<1x128xf32> to vector<8x128xf32>
    %35 = arith.addf %32, %34 : vector<8x128xf32>
    %c0_16 = arith.constant 0 : index
    %c0_17 = arith.constant 0 : index
    %36 = vector.load %arg6[%c0_16, %c0_17] : memref<8x128xf32, #tpu.memory_space<vmem>>, vector<8x128xf32>
    tpu.vector_store %arg6[%c0_16, %c0_17], %35 {strides = array<i32>} : memref<8x128xf32, #tpu.memory_space<vmem>>, vector<8x128xf32>,
    return
  }
}

</mosaic_0001>

<bundles_post_ra>
// kernel: tpu_custom_call.1
= control target key start
LH: loop header
LB: loop body
LE: loop exit
PB: predicated region body
PF: predicated region fallthrough
CT: control target
= control target key end

     0   :  { %11 = vsyncpa [#allocation3], 0  ;;  %s751_s0 = inlined_call_operand.vmem [shape: f32[8,1], index: 0, kind: input, shape index: {}]   ;;  %s752_s1 = inlined_call_operand.vmem [shape: f32[1,32], index: 1, kind: input, shape index: {}]   ;;  %s753_s2 = inlined_call_operand.hbm [shape: bf16[32,128], index: 2, kind: input, shape index: {}]   ;;  %s754_s3 = inlined_call_operand.vmem [shape: f32[1,128], index: 3, kind: input, shape index: {}]   ;;  %s755_s4 = inlined_call_operand.hbm [shape: bf16[128,128], index: 4, kind: input, shape index: {}]   ;;  %s756_s5 = inlined_call_operand.vmem [shape: f32[1,128], index: 5, kind: input, shape index: {}]   ;;  %s757_s6 = inlined_call_operand.hbm [shape: f32[8,128], index: 6, kind: output, shape index: {}]  }
   0x1   :  { %12 = vsyncpa [#allocation6], 0 }
   0x2   :  { %13 = vsyncpa [#allocation4], 0  ;;  %s647_s21 = smov [#allocation2]  }
   0x3   :  { %s23_s22 = sshll.u32 %s647_s21, 4  ;;  %s24_s22 = int_to_ptr.vmem [resolvable:$true] %s23_s22 }
   0x4   :  { %s589_s23 = scalar_lea.vmem %s24_s22, 256  ;;  %p594_p1 = scmp.lt.s32.totalorder %s24_s22, %s24_s22 }
   0x5   :  { %p590_p0 = scmp.ne.s32.totalorder %s24_s22, %s589_s23  ;;  %p595_p2 = scmp.lt.s32.totalorder %s589_s23, %s589_s23 }
   0x7   :  { %p596_p3 = por %p595_p2, %p594_p1 }
   0x9   :  { %p597_p4 = pnand %p596_p3, %p590_p0 }
   0xb   :  { %600 = shalt.err (!%p597_p4)
}
   0xc   :  { %s648_s24 = smov 64   ;;  %s649_s25 = smov 4  }
   0xd   :  { %29 = dma.hbm_to_vmem [thread:$0]  %s753_s2, 256, %s24_s22, [#allocation3], %s648_s24, %s648_s24, %s649_s25  }
   0xe   :  { %s650_s28 = smov [#allocation5]  }
   0xf   :  { %s37_s29 = sshll.u32 %s650_s28, 4  ;;  %s38_s29 = int_to_ptr.vmem [resolvable:$true] %s37_s29 }
  0x10   :  { %s609_s30 = scalar_lea.vmem %s38_s29, 1024  ;;  %p614_p6 = scmp.lt.s32.totalorder %s38_s29, %s38_s29 }
  0x11   :  { %p610_p5 = scmp.ne.s32.totalorder %s38_s29, %s609_s30  ;;  %p615_p7 = scmp.lt.s32.totalorder %s609_s30, %s609_s30 }
  0x13   :  { %p616_p8 = por %p615_p7, %p614_p6 }
  0x15   :  { %p617_p9 = pnand %p616_p8, %p610_p5 }
  0x17   :  { %620 = shalt.err (!%p617_p9)
}
  0x18   :  { %43 = dma.hbm_to_vmem [thread:$0]  %s755_s4, 1024, %s38_s29, [#allocation6], %s648_s24, %s648_s24, %s649_s25  }
  0x19   :  { %641 = dma.done.wait [#allocation3], 256  }
  0x1a   :  { %642 = vsyncadd [#allocation3], 4294967040 }
  0x1b   :  { %643 = dma.done.wait [#allocation6], 1024  }
  0x1c   :  { %644 = vsyncadd [#allocation6], 4294966272  ;;  %v651_v0 = vmov 0   ;;  %v53_v1 = vld [vmem:[%s751_s0] sm:$0xff]  ;;  %v565_v2 = vld [vmem:[#allocation2 + $0x8] sm:$0xff]   ;;  %v652_v3 = vmov 0.0  }
  0x1d   :  { %564 = vset.pattern.permute.xlu0 %v651_v0  ;;  %518 = vmatprep.subr.bf16.mxu0 %v652_v3  ;;  %vm653_vm0 = vmmov 0   ;;  %v566_v4 = vld [vmem:[#allocation2] sm:$0xff]   ;;  %v654_v18 = vmov 683565275   ;;  %v655_v20 = vmov 2475754826  }
  0x1e   :  { %57 = vperm.xlu0 %564, %v53_v1   ;;  %522 = vmatprep.mubr.msk.bf16.mxu0 %vm653_vm0, %v652_v3  ;;  %v484_v5 = vld [vmem:[%s752_s1] ss:$0 sm:$0xff]  ;;  %v656_v23 = vmov 2131351028   ;;  %v657_v26 = vmov 2102212464  }
  0x1f   :  { %519 = vmatpush3.bf16.msra.mxu0 %v565_v2  ;;  %526 = vmatprep.subr.bf16.mxu1 %v652_v3  ;;  %v658_v29 = vmov 920167782   ;;  %v659_v32 = vmov 1326507024  }
  0x20   :  { %520 = vmatprep.subr.bf16.mxu0 %v652_v3  ;;  %542 = vmatprep.mubr.msk.bf16.mxu1 %vm653_vm0, %v652_v3 }
  0x23   :  { %521 = vmatpush3.bf16.msra.mxu0 %v566_v4 }
  0x99   :  { %v58_v6 = vpop.permute.xlu0 %57 }
  0x9a   :  { %v713_v7 = vmul.f32 %v484_v5, %v58_v6 }
  0x9c   :  { %v73_v8 = vand.u32 2139095040, %v713_v7  ;;  %v70_v12 = vand.u32 2147483647, %v713_v7  ;;  %vm72_vm8 = vcmp.lt.s32.totalorder %v713_v7, 0 }
  0x9e   :  { %v74_v9 = vshrl.u32 %v73_v8, 23  ;;  %v77_v15 = vand.u32 8388607, %v70_v12  ;;  %vm71_vm9 = vcmp.le.f32.partialorder %v70_v12, 0.7853982 }
  0xa0   :  { %v485_v10 = vadd.s32 4294967169, %v74_v9  ;;  %v78_v34 = vor.u32 8388608, %v77_v15 }
  0xa2   :  { %v80_v11 = vadd.s32 1, %v485_v10  ;;  %v118_v48 = vshll.u32 %v78_v34, 8 }
  0xa4   :  { %vm81_vm1 = vcmp.gt.s32.totalorder %v80_v11, 0 }
  0xa5   :  { %v82_v13 = vsel %vm81_vm1, %v80_v11, 0  ;;  %vm162_vm1 = vweird.f32 %v713_v7 }
  0xa6   :  { %v84_v14 = vand.u32 31, %v82_v13  ;;  %v83_v17 = vshrl.u32 %v82_v13, 5 }
  0xa8   :  { %v85_v16 = vsub.s32 32, %v84_v14  ;;  %v87_v19 = vshll.u32 %v654_v18, %v84_v14  ;;  %v90_v21 = vshll.u32 %v655_v20, %v84_v14  ;;  %v93_v25 = vshll.u32 %v656_v23, %v84_v14 }
  0xa9   :  { %v96_v28 = vshll.u32 %v657_v26, %v84_v14  ;;  %v99_v31 = vshll.u32 %v658_v29, %v84_v14  ;;  %vm102_vm2 = vcmp.lt.s32.totalorder %v83_v17, 1  ;;  %vm105_vm3 = vcmp.lt.s32.totalorder %v83_v17, 4 }
  0xaa   :  { %v88_v22 = vshrl.u32 %v655_v20, %v85_v16  ;;  %v91_v24 = vshrl.u32 %v656_v23, %v85_v16  ;;  %v94_v27 = vshrl.u32 %v657_v26, %v85_v16  ;;  %v97_v30 = vshrl.u32 %v658_v29, %v85_v16 }
  0xab   :  { %v100_v33 = vshrl.u32 %v659_v32, %v85_v16  ;;  %v86_v43 = vshrl.u32 %v654_v18, %v85_v16  ;;  %vm104_vm4 = vcmp.lt.s32.totalorder %v83_v17, 3  ;;  %vm103_vm5 = vcmp.lt.s32.totalorder %v83_v17, 2 }
  0xac   :  { %v89_v35 = vor.u32 %v88_v22, %v87_v19  ;;  %v92_v36 = vor.u32 %v91_v24, %v90_v21  ;;  %v95_v37 = vor.u32 %v94_v27, %v93_v25  ;;  %v98_v38 = vor.u32 %v97_v30, %v96_v28 }
  0xad   :  { %v101_v39 = vor.u32 %v100_v33, %v99_v31  ;;  %v67_v29 = vlaneseq }
  0xae   :  { %v107_v40 = vsel %vm105_vm3, %v95_v37, 2102212464  ;;  %v110_v41 = vsel %vm102_vm2, %v89_v35, %v92_v36  ;;  %v114_v42 = vsel %vm102_vm2, %v92_v36, %v95_v37  ;;  %v111_v44 = vsel %vm105_vm3, %v98_v38, 920167782 }
  0xaf   :  { %v115_v45 = vsel %vm105_vm3, %v101_v39, 1326507024  ;;  %v112_v46 = vsel %vm104_vm4, %v95_v37, %v111_v44  ;;  %v106_v49 = vsel %vm102_vm2, %v86_v43, %v89_v35  ;;  %v108_v50 = vsel %vm104_vm4, %v92_v36, %v107_v40 }
  0xb0   :  { %v116_v47 = vsel %vm104_vm4, %v98_v38, %v115_v45  ;;  %v113_v51 = vsel %vm103_vm5, %v110_v41, %v112_v46  ;;  %v109_v57 = vsel %vm103_vm5, %v106_v49, %v108_v50  ;;  %v68_v32 = vand.u32 127, %v67_v29  ;;  %v567_v46 = vld [vmem:[#allocation5 + $0x38] sm:$0xff]   ;;  %v572_v50 = vld [vmem:[#allocation5 + $0x10] sm:$0xff]  }
  0xb1   :  { %v117_v52 = vsel %vm103_vm5, %v114_v42, %v116_v47  ;;  %v722_v55 = vmul.u32.u64.low %v118_v48, %v113_v51  ;;  %v723_v56 = vmul.u32.u64.high %v118_v48, %v113_v51, %v722_v55  ;;  %v125_v59 = vmul.u32 %v118_v48, %v109_v57  ;;  %527 = vmatpush3.bf16.msra.mxu1 %v567_v46  ;;  %v568_v47 = vld [vmem:[#allocation5 + $0x30] sm:$0xff]   ;;  %v571_v49 = vld [vmem:[#allocation5 + $0x18] sm:$0xff]   ;;  %v573_v51 = vld [vmem:[#allocation5 + $0x8] sm:$0xff]  }
  0xb2   :  { %v719_v53 = vmul.u32.u64.low %v118_v48, %v117_v52  ;;  %v720_v54 = vmul.u32.u64.high %v118_v48, %v117_v52, %v719_v53  ;;  %vm69_vm10 = vcmp.lt.s32.totalorder %v68_v32, 16  ;;  %vm302_vm2 = vcmask 261120   ;;  %528 = vmatprep.subr.bf16.mxu1 %v652_v3  ;;  %v569_v48 = vld [vmem:[#allocation5 + $0x28] sm:$0xff]   ;;  %v574_v52 = vld [vmem:[#allocation5] sm:$0xff]  }
  0xb3   :  { %v128_v58 = vadd.s32 1, %v723_v56  ;;  %v493_v53 = vld [vmem:[%s754_s3] ss:$0 sm:$0xff]  ;;  %s660_s3 = smov [#allocation7]  }
  0xb4   :  { %vm127_vm6 = vc.u32 %v720_v54, %v722_v55  ;;  %v126_v9 = vadd.s32 %v722_v55, %v720_v54  ;;  %s474_s13 = sshll.u32 %s660_s3, 4  ;;  %s475_s13 = int_to_ptr.vmem [resolvable:$true] %s474_s13 }
  0xb5   :  { %v129_v60 = vsel %vm127_vm6, %v128_v58, %v723_v56  ;;  %529 = vmatpush3.bf16.msra.mxu1 %v568_v47  ;;  %s621_s14 = scalar_lea.vmem %s475_s13, 128  ;;  %p626_p11 = scmp.lt.s32.totalorder %s475_s13, %s475_s13 }
  0xb6   :  { %v130_v61 = vadd.s32 %v129_v60, %v125_v59  ;;  %530 = vmatprep.subr.bf16.mxu1 %v652_v3  ;;  %p622_p10 = scmp.ne.s32.totalorder %s475_s13, %s621_s14  ;;  %p627_p12 = scmp.lt.s32.totalorder %s621_s14, %s621_s14 }
  0xb8   :  { %v131_v62 = vadd.s32 536870912, %v130_v61  ;;  %p628_p13 = por %p627_p12, %p626_p11 }
  0xb9   :  { %531 = vmatpush3.bf16.msra.mxu1 %v569_v48 }
  0xba   :  { %v132_v63 = vshrl.u32 %v131_v62, 30  ;;  %532 = vmatprep.subr.bf16.mxu1 %v652_v3  ;;  %p629_p0 = pnand %p628_p13, %p622_p10 }
  0xbc   :  { %v133_v0 = vshll.u32 %v132_v63, 30  ;;  %v156_v23 = vsub.s32 4, %v132_v63 }
  0xbe   :  { %v134_v1 = vsub.s32 %v130_v61, %v133_v0  ;;  %v157_v26 = vsel %vm72_vm8, %v156_v23, %v132_v63 }
  0xbf   :  { %v159_v27 = vsel %vm71_vm9, 0, %v157_v26 }
  0xc0   :  { %v136_v2 = vsub.s32 0, %v134_v1  ;;  %v163_v28 = vadd.s32 3, %v159_v27  ;;  %v267_v31 = vand.u32 3, %v159_v27 }
  0xc2   :  { %v486_v4 = vmin.u32 %v136_v2, %v134_v1  ;;  %v164_v30 = vand.u32 3, %v163_v28  ;;  %vm272_vm12 = vcmp.eq.s32.totalorder %v267_v31, 2  ;;  %vm269_vm14 = vcmp.eq.s32.totalorder %v267_v31, 0 }
  0xc3   :  { %vm268_vm0 = vcmp.lt.s32.totalorder %v267_v31, 2 }
  0xc4   :  { %v138_v5 = vclz %v486_v4  ;;  %vm169_vm11 = vcmp.eq.s32.totalorder %v164_v30, 2  ;;  %vm166_vm13 = vcmp.eq.s32.totalorder %v164_v30, 0  ;;  %vm165_vm15 = vcmp.lt.s32.totalorder %v164_v30, 2 }
  0xc6   :  { %v487_v6 = vadd.s32 4294967294, %v138_v5  ;;  %v497_v5 = vld [vmem:[%s756_s5] ss:$0 sm:$0xff] }
  0xc8   :  { %vm488_vm7 = vcmp.lt.s32.totalorder %v487_v6, 0 }
  0xc9   :  { %v141_v8 = vsel %vm488_vm7, 0, %v487_v6 }
  0xca   :  { %v142_v10 = vsub.s32 32, %v141_v8  ;;  %v146_v11 = vsub.s32 4294967266, %v141_v8  ;;  %v143_v13 = vshll.u32 %v134_v1, %v141_v8 }
  0xcc   :  { %v144_v14 = vshrl.u32 %v126_v9, %v142_v10  ;;  %v147_v15 = vadd.s32 127, %v146_v11 }
  0xce   :  { %v145_v16 = vor.u32 %v144_v14, %v143_v13  ;;  %v148_v17 = vshll.u32 %v147_v15, 23 }
  0xd0   :  { %v149_v18 = vor.u32 4788187, %v148_v17  ;;  %v152_v20 = vcvt.s32.f32 %v145_v16 }
  0xd2   :  { %v150_v19 = vand.u32 2147483647, %v149_v18 }
  0xd4   :  { %v153_v21 = vmul.f32 %v152_v20, %v150_v19 }
  0xd6   :  { %v154_v22 = vxor.u32 2147483648, %v153_v21 }
  0xd8   :  { %v155_v24 = vsel %vm72_vm8, %v154_v22, %v153_v21 }
  0xd9   :  { %v158_v25 = vsel %vm71_vm9, %v713_v7, %v155_v24  ;;  %v570_v7 = vld [vmem:[#allocation5 + $0x20] sm:$0xff]  }
  0xda   :  { %575 = vcosq.f32 %v158_v25  ;;  %533 = vmatpush3.bf16.msra.mxu1 %v570_v7 }
  0xdb   :  { %577 = vsinq.f32 %v158_v25  ;;  %534 = vmatprep.subr.bf16.mxu1 %v652_v3 }
  0xde   :  { %535 = vmatpush3.bf16.msra.mxu1 %v571_v49 }
  0xdf   :  { %536 = vmatprep.subr.bf16.mxu1 %v652_v3 }
  0xe2   :  { %537 = vmatpush3.bf16.msra.mxu1 %v572_v50 }
  0xe3   :  { %538 = vmatprep.subr.bf16.mxu1 %v652_v3 }
  0xe6   :  { %539 = vmatpush3.bf16.msra.mxu1 %v573_v51 }
  0xe7   :  { %v576_v33 = vpop.eup %575  ;;  %540 = vmatprep.subr.bf16.mxu1 %v652_v3 }
  0xe8   :  { %v578_v34 = vpop.eup %577  ;;  %v170_v35 = vxor.u32 2147483648, %v576_v33 }
  0xe9   :  { %v167_v36 = vxor.u32 2147483648, %v578_v34 }
  0xea   :  { %v171_v12 = vsel %vm169_vm11, %v170_v35, %v578_v34  ;;  %v274_v37 = vsel %vm272_vm12, %v170_v35, %v578_v34  ;;  %541 = vmatpush3.bf16.msra.mxu1 %v574_v52 }
  0xeb   :  { %v168_v38 = vsel %vm166_vm13, %v576_v33, %v167_v36  ;;  %v271_v39 = vsel %vm269_vm14, %v576_v33, %v167_v36 }
  0xec   :  { %v172_v40 = vsel %vm165_vm15, %v168_v38, %v171_v12  ;;  %v275_v41 = vsel %vm268_vm0, %v271_v39, %v274_v37 }
  0xed   :  { %v173_v42 = vsel %vm162_vm1, nan, %v172_v40  ;;  %v276_v43 = vsel %vm162_vm1, nan, %v275_v41 }
  0xee   :  { %v277_v44 = vsel %vm69_vm10, %v173_v42, %v276_v43 }
  0xef   :  { %v278_v45 = vpack.c.bf16 %v277_v44, %v277_v44 }
  0xf1   :  { %523 = vmatmul.mubr.msk.bf16.vlgmr.msra.gmra.mxu0 %vm302_vm2, %v278_v45 }
 0x1b1   :  { %v340_v54 = vpop.f32.mrf.mxu0 }
 0x1b2   :  { %v341_v55 = vadd.f32 %v493_v53, %v340_v54 }
 0x1b3   :  { %v524_v56 = vpop.f32.mrf.mxu0 }
 0x1b4   :  { %v346_v57 = vmul.f32 %v341_v55, %v341_v55 }
 0x1b5   :  { %v343_v58 = vpop.f32.mrf.mxu0 }
 0x1b6   :  { %v347_v59 = vmul.f32 %v346_v57, %v341_v55 }
 0x1b7   :  { %v525_v60 = vpop.f32.mrf.mxu0 }
 0x1b8   :  { %v348_v61 = vmul.f32 0.044715, %v347_v59 }
 0x1ba   :  { %v349_v62 = vadd.f32 %v348_v61, %v341_v55 }
 0x1bc   :  { %v350_v63 = vmul.f32 0.7978846, %v349_v62 }
 0x1be   :  { %579 = vtanh.f32 %v350_v63 }
 0x1cb   :  { %v580_v0 = vpop.eup %579 }
 0x1cc   :  { %v352_v1 = vadd.f32 1.0, %v580_v0 }
 0x1ce   :  { %v353_v2 = vmul.f32 0.5, %v352_v1 }
 0x1d0   :  { %v354_v3 = vmul.f32 %v353_v2, %v341_v55 }
 0x1d2   :  { %v355_v4 = vpack.c.bf16 %v354_v3, %v354_v3 }
 0x1d4   :  { %543 = vmatmul.mubr.bf16.vlgmr.msra.gmra.mxu1 %v355_v4 }
 0x294   :  { %v461_v6 = vpop.f32.mrf.mxu1 }
 0x295   :  { %v462_v8 = vadd.f32 %v497_v5, %v461_v6 }
 0x296   :  { %v544_v9 = vpop.f32.mrf.mxu1 }
 0x297   :  { %467 = vst [vmem:[#allocation7] sm:$0xff] %v462_v8 }
 0x298   :  { %v464_v10 = vpop.f32.mrf.mxu1 }
 0x299   :  { %632 = shalt.err (!%p629_p0)
}
 0x29a   :  { %477 = dma.vmem_to_hbm [thread:$0]  %s475_s13, 128, %s757_s6, [#allocation4]   ;;  %v545_v11 = vpop.f32.mrf.mxu1 }
 0x29b   :  { %645 = dma.done.wait [#allocation4], 128  }
 0x29c   :  { %646 = vsyncadd [#allocation4], 4294967168 }
 0x29d   :  { %481 = vsyncpa [#allocation3], 1 }
 0x29e   :  { %482 = vsyncpa [#allocation6], 1 }
 0x29f   :  { %483 = vsyncpa [#allocation4], 1 }

</bundles_post_ra>
